<compile_context>
chip_gen: v7x
topology: tpu7x:2x2x1
jax: 0.10.0
libtpu: 0.0.40
codegen_flags: <defaults>
</compile_context>

<pallas_src>
import functools

import jax
import jax.numpy as jnp
from jax.experimental import pallas as pl
from jax.experimental.pallas import tpu as pltpu


VEC_LANES = 256            # packed bias arg lane width (>= all padded hidden dims)
TILE_B_MAX = 2048          # max batch tile (~0.7 MB bf16 x-tile; amortizes step overhead)
MXU_DTYPE = jnp.bfloat16   # MXU input dtype (f32 accumulation); jnp.float32 for exact f32


def _round_up(n, m):
    return (n + m - 1) // m * m


def _cdiv(a, b):
    return -(-a // b)


# ----------------------------- Pallas kernel --------------------------------

def seqnet_kernel(x_ref, w1_ref, w2_ref, w3_ref, w4_ref, vec_ref, out_ref):
    """One batch tile of the fused SeqNet MLP (BN pre-folded, dims pre-padded)."""
    md = w1_ref.dtype
    d1, d2, d3, d4 = (w1_ref.shape[1], w2_ref.shape[1],
                      w3_ref.shape[1], w4_ref.shape[1])

    # Packed small vectors: rows = [b1, b2, b3, b4, 0, 0, 0, 0], f32.
    vec = vec_ref[...]                       # (8, VEC_LANES)
    b1 = vec[0:1, :d1]
    b2 = vec[1:2, :d2]
    b3 = vec[2:3, :d3]
    b4 = vec[3:4, :d4]

    # x arrives already in the MXU dtype (bf16) with c/i appended as columns
    # and zero-padded features; padded columns/rows contribute exact zeros.
    x = x_ref[...]                           # (tile_b, in_pad)

    # Layer 1: Linear(in_nodes,136)+BN1+ReLU   (f32 accumulation)
    h = jnp.dot(x, w1_ref[...], preferred_element_type=jnp.float32) + b1
    h = jnp.maximum(h, 0.0)
    # TODO(synk): nn.Dropout(p=0.25) is identity in eval mode; train-mode RNG mask omitted.

    # Layer 2: Linear(136,68)+BN2+ReLU
    h = jnp.dot(h.astype(md), w2_ref[...], preferred_element_type=jnp.float32) + b2
    h = jnp.maximum(h, 0.0)

    # Layer 3: Linear(68,34)+BN3+ReLU
    h = jnp.dot(h.astype(md), w3_ref[...], preferred_element_type=jnp.float32) + b3
    h = jnp.maximum(h, 0.0)

    # Output: Linear(34,2) + log_softmax over dim=1 (f32 VPU/EUP math)
    logits = jnp.dot(h.astype(md), w4_ref[...], preferred_element_type=jnp.float32) + b4
    m = jnp.max(logits, axis=-1, keepdims=True)
    z = logits - m
    out_ref[...] = z - jnp.log(jnp.sum(jnp.exp(z), axis=-1, keepdims=True))
    # TODO(synk): at very large serving batches, packing the 2-wide logits into a
    # lane-dense (tile_b*2//128, 128) slab would replace the masked vst's; the
    # output is ~2% of HBM traffic here, so it is left as a follow-up.


# ------------------------------ JAX wrapper ----------------------------------

@functools.partial(jax.jit, static_argnames=("tile_b",))
def _seqnet_pallas(x, c_prot, i_prot, arrays, *, tile_b):
    B = x.shape[0]
    w1 = arrays["w1"]
    in_pad = w1.shape[0]
    d_out = arrays["w4"].shape[1]

    # Fold c_prot / i_prot into the x tile as two extra columns, zero-pad the
    # feature dim to the padded contraction width and the batch to a multiple
    # of tile_b, and stream in the MXU dtype (bf16 halves HBM read traffic).
    xm = jnp.concatenate(
        [x.reshape(B, -1), c_prot.reshape(B, -1), i_prot.reshape(B, -1)],
        axis=1).astype(jnp.float32)
    in_feat = xm.shape[1]
    Bp = _round_up(B, tile_b)
    xm = jnp.pad(xm, ((0, Bp - B), (0, in_pad - in_feat))).astype(w1.dtype)
    # NOTE: padded batch rows flow through exp/log in log_softmax; values are
    # finite and sliced off below — never reduce over the padded rows.

    grid = (Bp // tile_b,)

    out = pl.pallas_call(
        seqnet_kernel,
        out_shape=jax.ShapeDtypeStruct((Bp, d_out), jnp.float32),
        grid=grid,
        in_specs=[
            pl.BlockSpec((tile_b, in_pad), lambda g: (g, 0)),     # streamed x tile
            pl.BlockSpec(arrays["w1"].shape, lambda g: (0, 0)),   # weights stay
            pl.BlockSpec(arrays["w2"].shape, lambda g: (0, 0)),   # VMEM-resident
            pl.BlockSpec(arrays["w3"].shape, lambda g: (0, 0)),
            pl.BlockSpec(arrays["w4"].shape, lambda g: (0, 0)),
            pl.BlockSpec(arrays["vec"].shape, lambda g: (0, 0)),  # packed biases
        ],
        out_specs=pl.BlockSpec((tile_b, d_out), lambda g: (g, 0)),
        compiler_params=pltpu.CompilerParams(
            # "parallel" lets megacore / v7x's 2 TCs shard batch tiles.
            # TODO(synk): evaluate pltpu.CORE_PARALLEL on the batch axis for v7x.
            dimension_semantics=("parallel",),
            # Explicit limit: v5e's default scoped VMEM is only 16 MiB; the
            # footprint (weights ~190 KB + double-buffered x tiles + f32
            # intermediates) is < 8 MiB even at tile_b = TILE_B_MAX.
            vmem_limit_bytes=32 * 1024 * 1024),
    )(xm, arrays["w1"], arrays["w2"], arrays["w3"], arrays["w4"], arrays["vec"])
    return out[:B]


def _choose_tile_b(B):
    """Big tiles to amortize per-step overhead; >=2 even tiles at serving batch
    so both v7x TensorCores get balanced work; minimal batch-pad waste."""
    b8 = _round_up(max(B, 1), 8)
    if b8 <= 256:
        return b8                          # small batch: single tile, no waste
    n_tiles = max(2, _cdiv(b8, TILE_B_MAX))
    if n_tiles % 2:
        n_tiles += 1                       # even tile count balances the 2 TCs
    return _round_up(_cdiv(b8, n_tiles), 8)


def seqnet_forward(x, c_prot, i_prot, prepared, tile_b=None):
    B = x.shape[0]
    in_feat = (x.reshape(B, -1).shape[1] + c_prot.reshape(B, -1).shape[1]
               + i_prot.reshape(B, -1).shape[1])
    assert in_feat == prepared["in_feat"], (
        f"concat feature width {in_feat} != model in_nodes {prepared['in_feat']}")
    if tile_b is None:
        tile_b = _choose_tile_b(B)
    return _seqnet_pallas(x, c_prot, i_prot, prepared["arrays"], tile_b=tile_b)


# -------------------- one-time param preparation (host side) -----------------

def prepare_params(params, mxu_dtype=MXU_DTYPE, eps=1e-5):
    """Fold BN into W/b, zero-pad dims to TPU-friendly sizes, pack biases.

    Done ONCE at param-load time, not per forward call.  Zero-padded rows /
    columns stay exactly zero through bias-add + ReLU, so the real outputs are
    identical to the unpadded computation.
    """
    def fold(w, b, bn):
        gamma, beta, mean, var = bn
        s = gamma / jnp.sqrt(var + eps)
        return w * s[None, :], b * s + (beta - mean * s)

    w1, b1 = fold(params["w1"], params["b1"], params["bn1"])
    w2, b2 = fold(params["w2"], params["b2"], params["bn2"])
    w3, b3 = fold(params["w3"], params["b3"], params["bn3"])
    w4, b4 = params["w4"], params["b4"]

    in_nodes = int(w1.shape[0])

    # Contraction dims -> multiples of 16 (bf16 sublane packing);
    # hidden widths  -> multiples of 128 (lane-dense ReLU / bias vregs);
    # output classes stay unpadded (log_softmax must only see real logits).
    in_pad = _round_up(in_nodes, 16)
    d1p = _round_up(w1.shape[1], 128)
    d2p = _round_up(w2.shape[1], 128)
    d3p = _round_up(w3.shape[1], 128)
    d4 = int(w4.shape[1])
    assert max(d1p, d2p, d3p, d4) <= VEC_LANES

    def pad2(w, rows, cols):
        return jnp.pad(w, ((0, rows - w.shape[0]), (0, cols - w.shape[1])))

    w1 = pad2(w1, in_pad, d1p)
    w2 = pad2(w2, d1p, d2p)
    w3 = pad2(w3, d2p, d3p)
    w4 = pad2(w4, d3p, d4)

    def pad_row(v):
        v = jnp.asarray(v, jnp.float32).reshape(-1)
        return jnp.pad(v, (0, VEC_LANES - v.shape[0]))

    zeros = jnp.zeros((VEC_LANES,), jnp.float32)
    vec = jnp.stack([pad_row(b1), pad_row(b2), pad_row(b3), pad_row(b4),
                     zeros, zeros, zeros, zeros], axis=0)        # (8, 256) f32

    arrays = {
        "w1": jax.device_put(w1.astype(mxu_dtype)),
        "w2": jax.device_put(w2.astype(mxu_dtype)),
        "w3": jax.device_put(w3.astype(mxu_dtype)),
        "w4": jax.device_put(w4.astype(mxu_dtype)),
        "vec": jax.device_put(vec),
    }
    return {"arrays": arrays, "in_feat": in_nodes}


# -------------------------- pure-JAX reference --------------------------------

def reference_forward(x, c_prot, i_prot, prepared):
    """Mirrors the kernel math (same padded/folded params, same dot dtypes).

    Note: this validates the kernel, not bit-parity with the f32 PyTorch model;
    set MXU_DTYPE = jnp.float32 for exact-f32 parity checks.
    """
    arr = prepared["arrays"]
    B = x.shape[0]
    xm = jnp.concatenate(
        [x.reshape(B, -1), c_prot.reshape(B, -1), i_prot.reshape(B, -1)],
        axis=1).astype(jnp.float32)
    in_pad = arr["w1"].shape[0]
    xm = jnp.pad(xm, ((0, 0), (0, in_pad - xm.shape[1]))).astype(arr["w1"].dtype)

    vec = arr["vec"]
    d1, d2, d3, d4 = (arr["w1"].shape[1], arr["w2"].shape[1],
                      arr["w3"].shape[1], arr["w4"].shape[1])
    md = arr["w1"].dtype

    h = jnp.maximum(
        jnp.dot(xm, arr["w1"], preferred_element_type=jnp.float32) + vec[0, :d1], 0.0)
    h = jnp.maximum(
        jnp.dot(h.astype(md), arr["w2"], preferred_element_type=jnp.float32) + vec[1, :d2], 0.0)
    h = jnp.maximum(
        jnp.dot(h.astype(md), arr["w3"], preferred_element_type=jnp.float32) + vec[2, :d3], 0.0)
    logits = jnp.dot(h.astype(md), arr["w4"], preferred_element_type=jnp.float32) + vec[3, :d4]
    return jax.nn.log_softmax(logits, axis=1)


# -------------------------- deterministic params ------------------------------

def init_params(key, in_nodes):
    dims = [(in_nodes, 136), (136, 68), (68, 34), (34, 2)]
    params = {}
    keys = jax.random.split(key, 16)
    ki = 0
    for idx, (din, dout) in enumerate(dims, start=1):
        bound = 1.0 / jnp.sqrt(din)
        # stored pre-transposed: (in, out), so kernel does x @ W
        params[f"w{idx}"] = jax.random.uniform(
            keys[ki], (din, dout), jnp.float32, -bound, bound); ki += 1
        params[f"b{idx}"] = jax.random.uniform(
            keys[ki], (dout,), jnp.float32, -bound, bound); ki += 1
    # BatchNorm1d params (eval mode): gamma, beta, running_mean, running_var
    for name, dim in (("bn1", 136), ("bn2", 68), ("bn3", 34)):
        gamma = 1.0 + 0.1 * jax.random.normal(keys[ki], (dim,), jnp.float32); ki += 1
        beta = 0.1 * jax.random.normal(keys[ki], (dim,), jnp.float32); ki += 1
        mean = 0.05 * jnp.arange(dim, dtype=jnp.float32) / dim
        var = 1.0 + 0.01 * jnp.arange(dim, dtype=jnp.float32) / dim
        params[name] = (gamma, beta, mean, var)
    return params


# ----------------------------------- main -------------------------------------

if __name__ == "__main__":
    WINDOW_SIZE = 8                       # options.window_size
    IN_NODES = WINDOW_SIZE * 20 + 2       # = 162
    B = 8                                 # batch

    key = jax.random.PRNGKey(0)
    kx, kc, ki_, kp = jax.random.split(key, 4)

    # x: (B, window_size, 20) sequence window; c_prot/i_prot: (B, 1) scalars
    x = jax.random.normal(kx, (B, WINDOW_SIZE, 20), jnp.float32)
    c_prot = jax.random.normal(kc, (B, 1), jnp.float32)
    i_prot = jax.random.normal(ki_, (B, 1), jnp.float32)

    params = init_params(kp, IN_NODES)
    prepared = prepare_params(params)     # one-time: BN fold + padding + bf16 + packing

    out = seqnet_forward(x, c_prot, i_prot, prepared)
    out = jax.block_until_ready(out)

    assert out.shape == (B, 2)
    # log_softmax rows should exp-sum to 1
    assert jnp.allclose(jnp.sum(jnp.exp(out), axis=1), 1.0, atol=1e-4)
    # cross-check against the pure-JAX reference (same folded params / dtypes)
    ref = reference_forward(x, c_prot, i_prot, prepared)
    assert jnp.allclose(out, ref, atol=2e-3, rtol=2e-3), float(jnp.max(jnp.abs(out - ref)))

    print("KERNEL_OK")
</pallas_src>

<mosaic_0001>
module attributes {stable_mosaic.version = 11 : i64} {
  func.func @seqnet_kernel(%arg0: i32, %arg1: memref<8x176xbf16, #tpu.memory_space<vmem>>, %arg2: memref<176x256xbf16, #tpu.memory_space<vmem>>, %arg3: memref<256x128xbf16, #tpu.memory_space<vmem>>, %arg4: memref<128x128xbf16, #tpu.memory_space<vmem>>, %arg5: memref<128x2xbf16, #tpu.memory_space<vmem>>, %arg6: memref<8x256xf32, #tpu.memory_space<vmem>>, %arg7: memref<8x2xf32, #tpu.memory_space<vmem>>) attributes {dimension_semantics = [#tpu.dimension_semantics<parallel>], iteration_bounds = array<i64: 1>, scalar_prefetch = 0 : i64, scratch_operands = 0 : i64, tpu.core_type = #tpu.core_type<tc>, window_params = [{transform_indices = @transform_0, window_bounds = array<i64: 8, 176>}, {pipeline_mode = #tpu.pipeline_mode<synchronous>, transform_indices = @transform_1, window_bounds = array<i64: 176, 256>}, {pipeline_mode = #tpu.pipeline_mode<synchronous>, transform_indices = @transform_2, window_bounds = array<i64: 256, 128>}, {pipeline_mode = #tpu.pipeline_mode<synchronous>, transform_indices = @transform_3, window_bounds = array<i64: 128, 128>}, {pipeline_mode = #tpu.pipeline_mode<synchronous>, transform_indices = @transform_4, window_bounds = array<i64: 128, 2>}, {pipeline_mode = #tpu.pipeline_mode<synchronous>, transform_indices = @transform_5, window_bounds = array<i64: 8, 256>}, {transform_indices = @transform_6, window_bounds = array<i64: 8, 2>}]} {
    %c0 = arith.constant 0 : index
    %c0_0 = arith.constant 0 : index
    %0 = vector.load %arg6[%c0, %c0_0] : memref<8x256xf32, #tpu.memory_space<vmem>>, vector<8x256xf32>
    %1 = vector.extract_strided_slice %0 {offsets = [0, 0], sizes = [1, 256], strides = [1, 1]} : vector<8x256xf32> to vector<1x256xf32>
    %2 = vector.extract_strided_slice %0 {offsets = [1, 0], sizes = [1, 128], strides = [1, 1]} : vector<8x256xf32> to vector<1x128xf32>
    %3 = vector.extract_strided_slice %0 {offsets = [2, 0], sizes = [1, 128], strides = [1, 1]} : vector<8x256xf32> to vector<1x128xf32>
    %4 = vector.extract_strided_slice %0 {offsets = [3, 0], sizes = [1, 2], strides = [1, 1]} : vector<8x256xf32> to vector<1x2xf32>
    %c0_1 = arith.constant 0 : index
    %c0_2 = arith.constant 0 : index
    %5 = vector.load %arg1[%c0_1, %c0_2] : memref<8x176xbf16, #tpu.memory_space<vmem>>, vector<8x176xbf16>
    %c0_3 = arith.constant 0 : index
    %c0_4 = arith.constant 0 : index
    %6 = vector.load %arg2[%c0_3, %c0_4] : memref<176x256xbf16, #tpu.memory_space<vmem>>, vector<176x256xbf16>
    %cst = arith.constant dense<0.000000e+00> : vector<8x256xf32>
    %7 = tpu.matmul %5, %6, %cst {dimension_numbers = #tpu.dot_dimension_numbers<[1], [0], [0], [1], [0, 0, 1, 1], [], []>} : vector<8x176xbf16>, vector<176x256xbf16>, vector<8x256xf32> -> vector<8x256xf32>
    %8 = vector.broadcast %1 : vector<1x256xf32> to vector<8x256xf32>
    %9 = arith.addf %7, %8 : vector<8x256xf32>
    %cst_5 = arith.constant 0.000000e+00 : f32
    %10 = vector.broadcast %cst_5 : f32 to vector<8x256xf32>
    %11 = arith.maximumf %9, %10 : vector<8x256xf32>
    %12 = arith.truncf %11 : vector<8x256xf32> to vector<8x256xbf16>
    %c0_6 = arith.constant 0 : index
    %c0_7 = arith.constant 0 : index
    %13 = vector.load %arg3[%c0_6, %c0_7] : memref<256x128xbf16, #tpu.memory_space<vmem>>, vector<256x128xbf16>
    %cst_8 = arith.constant dense<0.000000e+00> : vector<8x128xf32>
    %14 = tpu.matmul %12, %13, %cst_8 {dimension_numbers = #tpu.dot_dimension_numbers<[1], [0], [0], [1], [0, 0, 1, 1], [], []>} : vector<8x256xbf16>, vector<256x128xbf16>, vector<8x128xf32> -> vector<8x128xf32>
    %15 = vector.broadcast %2 : vector<1x128xf32> to vector<8x128xf32>
    %16 = arith.addf %14, %15 : vector<8x128xf32>
    %cst_9 = arith.constant 0.000000e+00 : f32
    %17 = vector.broadcast %cst_9 : f32 to vector<8x128xf32>
    %18 = arith.maximumf %16, %17 : vector<8x128xf32>
    %19 = arith.truncf %18 : vector<8x128xf32> to vector<8x128xbf16>
    %c0_10 = arith.constant 0 : index
    %c0_11 = arith.constant 0 : index
    %20 = vector.load %arg4[%c0_10, %c0_11] : memref<128x128xbf16, #tpu.memory_space<vmem>>, vector<128x128xbf16>
    %cst_12 = arith.constant dense<0.000000e+00> : vector<8x128xf32>
    %21 = tpu.matmul %19, %20, %cst_12 {dimension_numbers = #tpu.dot_dimension_numbers<[1], [0], [0], [1], [0, 0, 1, 1], [], []>} : vector<8x128xbf16>, vector<128x128xbf16>, vector<8x128xf32> -> vector<8x128xf32>
    %22 = vector.broadcast %3 : vector<1x128xf32> to vector<8x128xf32>
    %23 = arith.addf %21, %22 : vector<8x128xf32>
    %cst_13 = arith.constant 0.000000e+00 : f32
    %24 = vector.broadcast %cst_13 : f32 to vector<8x128xf32>
    %25 = arith.maximumf %23, %24 : vector<8x128xf32>
    %26 = arith.truncf %25 : vector<8x128xf32> to vector<8x128xbf16>
    %c0_14 = arith.constant 0 : index
    %c0_15 = arith.constant 0 : index
    %27 = vector.load %arg5[%c0_14, %c0_15] : memref<128x2xbf16, #tpu.memory_space<vmem>>, vector<128x2xbf16>
    %cst_16 = arith.constant dense<0.000000e+00> : vector<8x2xf32>
    %28 = tpu.matmul %26, %27, %cst_16 {dimension_numbers = #tpu.dot_dimension_numbers<[1], [0], [0], [1], [0, 0, 1, 1], [], []>} : vector<8x128xbf16>, vector<128x2xbf16>, vector<8x2xf32> -> vector<8x2xf32>
    %29 = vector.broadcast %4 : vector<1x2xf32> to vector<8x2xf32>
    %30 = arith.addf %28, %29 : vector<8x2xf32>
    %cst_17 = arith.constant dense<0xFF800000> : vector<8xf32>
    %31 = vector.multi_reduction <maximumf>, %30, %cst_17 [1] : vector<8x2xf32> to vector<8xf32>
    %32 = vector.shape_cast %31 : vector<8xf32> to vector<8x1xf32>
    %33 = vector.broadcast %32 : vector<8x1xf32> to vector<8x2xf32>
    %34 = arith.subf %30, %33 : vector<8x2xf32>
    %35 = math.exp %34 : vector<8x2xf32>
    %cst_18 = arith.constant dense<0.000000e+00> : vector<8xf32>
    %36 = vector.multi_reduction <add>, %35, %cst_18 [1] : vector<8x2xf32> to vector<8xf32>
    %37 = vector.shape_cast %36 : vector<8xf32> to vector<8x1xf32>
    %38 = math.log %37 : vector<8x1xf32>
    %39 = vector.broadcast %38 : vector<8x1xf32> to vector<8x2xf32>
    %40 = arith.subf %34, %39 : vector<8x2xf32>
    %c0_19 = arith.constant 0 : index
    %c0_20 = arith.constant 0 : index
    %41 = vector.load %arg7[%c0_19, %c0_20] : memref<8x2xf32, #tpu.memory_space<vmem>>, vector<8x2xf32>
    tpu.vector_store %arg7[%c0_19, %c0_20], %40 {strides = array<i32>} : memref<8x2xf32, #tpu.memory_space<vmem>>, vector<8x2xf32>,
    return
  }
  func.func @transform_0(%arg0: i32) -> (i32, i32) {
    %c0_i32 = arith.constant 0 : i32
    %c0_i32_0 = arith.constant 0 : i32
    return %arg0, %c0_i32 : i32, i32
  }
  func.func @transform_1(%arg0: i32) -> (i32, i32) {
    %c0_i32 = arith.constant 0 : i32
    %c0_i32_0 = arith.constant 0 : i32
    %c0_i32_1 = arith.constant 0 : i32
    return %c0_i32, %c0_i32_0 : i32, i32
  }
  func.func @transform_2(%arg0: i32) -> (i32, i32) {
    %c0_i32 = arith.constant 0 : i32
    %c0_i32_0 = arith.constant 0 : i32
    %c0_i32_1 = arith.constant 0 : i32
    return %c0_i32, %c0_i32_0 : i32, i32
  }
  func.func @transform_3(%arg0: i32) -> (i32, i32) {
    %c0_i32 = arith.constant 0 : i32
    %c0_i32_0 = arith.constant 0 : i32
    %c0_i32_1 = arith.constant 0 : i32
    return %c0_i32, %c0_i32_0 : i32, i32
  }
  func.func @transform_4(%arg0: i32) -> (i32, i32) {
    %c0_i32 = arith.constant 0 : i32
    %c0_i32_0 = arith.constant 0 : i32
    %c0_i32_1 = arith.constant 0 : i32
    return %c0_i32, %c0_i32_0 : i32, i32
  }
  func.func @transform_5(%arg0: i32) -> (i32, i32) {
    %c0_i32 = arith.constant 0 : i32
    %c0_i32_0 = arith.constant 0 : i32
    %c0_i32_1 = arith.constant 0 : i32
    return %c0_i32, %c0_i32_0 : i32, i32
  }
  func.func @transform_6(%arg0: i32) -> (i32, i32) {
    %c0_i32 = arith.constant 0 : i32
    %c0_i32_0 = arith.constant 0 : i32
    return %arg0, %c0_i32 : i32, i32
  }
}

</mosaic_0001>

<bundles_post_ra>
// kernel: _seqnet_pallas.1
= control target key start
LH: loop header
LB: loop body
LE: loop exit
PB: predicated region body
PF: predicated region fallthrough
CT: control target
= control target key end

     0   :  { %11 = vsyncpa [#allocation3], 0  ;;  %s884_s21 = smov [#allocation2]   ;;  %s1095_s0 = inlined_call_operand.vmem [shape: bf16[8,176], index: 0, kind: input, shape index: {}]   ;;  %s1096_s1 = inlined_call_operand.vmem [shape: bf16[176,256], index: 1, kind: input, shape index: {}]   ;;  %s1097_s2 = inlined_call_operand.hbm [shape: bf16[256,128], index: 2, kind: input, shape index: {}]   ;;  %s1098_s3 = inlined_call_operand.vmem [shape: bf16[128,128], index: 3, kind: input, shape index: {}]   ;;  %s1099_s4 = inlined_call_operand.vmem [shape: bf16[128,2], index: 4, kind: input, shape index: {}]   ;;  %s1100_s5 = inlined_call_operand.vmem [shape: f32[8,256], index: 5, kind: input, shape index: {}]   ;;  %s1101_s6 = inlined_call_operand.vmem [shape: f32[8,2], index: 6, kind: output, shape index: {}]  }
   0x1   :  { %s21_s22 = sshll.u32 %s884_s21, 4  ;;  %s860_s25 = scalar_lea.hbm %s1097_s2, 2048  ;;  %s22_s22 = int_to_ptr.vmem [resolvable:$true] %s21_s22 }
   0x2   :  { %p861_p0 = scmp.ne.s32.totalorder %s1097_s2, %s860_s25  ;;  %p864_p1 = scmp.lt.u32.totalorder %s860_s25, %s1097_s2 }
   0x4   :  { %p866_p2 = pnand %p864_p1, %p861_p0 }
   0x6   :  { %869 = shalt.err (!%p866_p2)
}
   0x7   :  { %s870_s30 = scalar_lea.vmem %s22_s22, 2048  ;;  %p875_p4 = scmp.lt.s32.totalorder %s22_s22, %s22_s22 }
   0x8   :  { %p871_p3 = scmp.ne.s32.totalorder %s22_s22, %s870_s30  ;;  %p876_p5 = scmp.lt.s32.totalorder %s870_s30, %s870_s30 }
   0xa   :  { %p877_p6 = por %p876_p5, %p875_p4 }
   0xc   :  { %p878_p7 = pnand %p877_p6, %p871_p3 }
   0xe   :  { %881 = shalt.err (!%p878_p7)
}
   0xf   :  { %s885_s7 = smov 64   ;;  %s886_s8 = smov 4  }
  0x10   :  { %27 = dma.hbm_to_vmem [thread:$0]  %s1097_s2, 2048, %s22_s22, [#allocation3], %s885_s7, %s885_s7, %s886_s8  }
  0x11   :  { %882 = dma.done.wait [#allocation3], 2048  }
  0x12   :  { %883 = vsyncadd [#allocation3], 4294965248  ;;  %v789_v0 = vld [vmem:[%s1096_s1 + $0x4] ss:$8 sps:$4 sm:$0xff]   ;;  %v791_v1 = vld [vmem:[%s1096_s1] ss:$8 sps:$4 sm:$0xff]   ;;  %v63_v42 = vlaneseq }
  0x13   :  { %191 = vmatprep.subr.bf16.mxu0 %v789_v0  ;;  %v792_v2 = vld [vmem:[%s1096_s1 + $0x14] ss:$8 sps:$4 sm:$0xff]   ;;  %v794_v3 = vld [vmem:[%s1096_s1 + $0x10] ss:$8 sps:$4 sm:$0xff]   ;;  %v795_v4 = vld [vmem:[%s1096_s1 + $0x24] ss:$8 sps:$4 sm:$0xff]  }
  0x14   :  { %192 = vmatpush1.bf16.msra.mxu0 %v791_v1  ;;  %v797_v5 = vld [vmem:[%s1096_s1 + $0x20] ss:$8 sps:$4 sm:$0xff]   ;;  %v798_v6 = vld [vmem:[%s1096_s1 + $0x34] ss:$8 sps:$4 sm:$0xff]   ;;  %v800_v7 = vld [vmem:[%s1096_s1 + $0x30] ss:$8 sps:$4 sm:$0xff]  }
  0x15   :  { %193 = vmatprep.subr.bf16.mxu0 %v792_v2  ;;  %v801_v8 = vld [vmem:[%s1096_s1 + $0x44] ss:$8 sps:$4 sm:$0xff]   ;;  %v803_v9 = vld [vmem:[%s1096_s1 + $0x40] ss:$8 sps:$4 sm:$0xff]   ;;  %v804_v10 = vld [vmem:[%s1096_s1 + $0x54] ss:$8 sps:$4 sm:$0xff]  }
  0x16   :  { %v40_v11 = vld [vmem:[%s1095_s0] sm:$0xff]  ;;  %vm187_vm0 = vcmask 392192   ;;  %v806_v15 = vld [vmem:[%s1096_s1 + $0x50] ss:$8 sps:$4 sm:$0xff]   ;;  %v826_v16 = vld [vmem:[#allocation2 + $0x48] sm:$0xff]   ;;  %v887_v41 = vmov 0.0  }
  0x17   :  { %v648_v12 = vcombine.high %v40_v11, %v40_v11  ;;  %v824_v13 = vld [vmem:[#allocation2 + $0x40] sm:$0xff]   ;;  %v827_v17 = vld [vmem:[#allocation2 + $0x8] sm:$0xff]   ;;  %v828_v18 = vld [vmem:[#allocation2 + $0x50] sm:$0xff]   ;;  %v647_v36 = vcombine.low %v40_v11, %v40_v11  ;;  %v1007_v43 = vshrl.u32 %v63_v42, 7  ;;  %vm888_vm1 = vmmov 0  }
  0x18   :  { %194 = vmatpush1.bf16.msra.mxu0 %v794_v3  ;;  %v825_v14 = vld [vmem:[#allocation2] sm:$0xff]   ;;  %704 = vmatprep.subr.bf16.mxu1 %v824_v13  ;;  %v829_v21 = vld [vmem:[#allocation2 + $0x10] sm:$0xff]   ;;  %v830_v22 = vld [vmem:[#allocation2 + $0x58] sm:$0xff]   ;;  %vm628_vm2 = vcmask 15360  }
  0x19   :  { %195 = vmatprep.subr.bf16.mxu0 %v795_v4  ;;  %671 = vmatprep.mubr.msk.bf16.mxu0 %vm187_vm0, %v648_v12  ;;  %v807_v19 = vld [vmem:[%s1096_s1 + $0x64] ss:$8 sps:$4 sm:$0xff]   ;;  %v809_v20 = vld [vmem:[%s1096_s1 + $0x60] ss:$8 sps:$4 sm:$0xff]   ;;  %v810_v23 = vld [vmem:[%s1096_s1 + $0x74] ss:$8 sps:$4 sm:$0xff]  }
  0x1a   :  { %705 = vmatpush3.bf16.msra.mxu1 %v825_v14  ;;  %v812_v24 = vld [vmem:[%s1096_s1 + $0x70] ss:$8 sps:$4 sm:$0xff]   ;;  %v813_v25 = vld [vmem:[%s1096_s1 + $0x84] ss:$8 sps:$4 sm:$0xff]   ;;  %v815_v29 = vld [vmem:[%s1096_s1 + $0x80] ss:$8 sps:$4 sm:$0xff]  }
  0x1b   :  { %706 = vmatprep.subr.bf16.mxu1 %v826_v16  ;;  %v831_v26 = vld [vmem:[#allocation2 + $0x18] sm:$0xff]   ;;  %v832_v27 = vld [vmem:[#allocation2 + $0x60] sm:$0xff]   ;;  %v834_v30 = vld [vmem:[#allocation2 + $0x68] sm:$0xff]   ;;  %v65_v44 = vsub.s32 0, %v1007_v43 }
  0x1c   :  { %196 = vmatpush1.bf16.msra.mxu0 %v797_v5  ;;  %v833_v28 = vld [vmem:[#allocation2 + $0x20] sm:$0xff]   ;;  %v816_v31 = vld [vmem:[%s1096_s1 + $0x94] ss:$8 sps:$4 sm:$0xff]   ;;  %v835_v32 = vld [vmem:[#allocation2 + $0x28] sm:$0xff]  }
  0x1d   :  { %197 = vmatprep.subr.bf16.mxu0 %v798_v6  ;;  %v818_v33 = vld [vmem:[%s1096_s1 + $0x90] ss:$8 sps:$4 sm:$0xff]   ;;  %v819_v34 = vld [vmem:[%s1096_s1 + $0xa4] ss:$8 sps:$4 sm:$0xff]   ;;  %v821_v35 = vld [vmem:[%s1096_s1 + $0xa0] ss:$8 sps:$4 sm:$0xff]  }
  0x1e   :  { %707 = vmatpush3.bf16.msra.mxu1 %v827_v17  ;;  %v836_v37 = vld [vmem:[#allocation2 + $0x70] sm:$0xff]   ;;  %v838_v39 = vld [vmem:[#allocation2 + $0x78] sm:$0xff]   ;;  %v1013_v45 = vld [vmem:[%s1100_s5] sm:$0xff] }
  0x1f   :  { %708 = vmatprep.subr.bf16.mxu1 %v828_v18  ;;  %v837_v38 = vld [vmem:[#allocation2 + $0x30] sm:$0xff]   ;;  %v839_v40 = vld [vmem:[#allocation2 + $0x38] sm:$0xff]   ;;  %v39_v46 = vld [vmem:[%s1100_s5 + $0x8] sm:$0xff]  ;;  %v66_v47 = vrot.slane %v1013_v45, %v65_v44 }
  0x20   :  { %198 = vmatpush1.bf16.msra.mxu0 %v800_v7  ;;  %v70_v48 = vrot.slane %v39_v46, %v65_v44  ;;  %v840_v58 = vld [vmem:[%s1098_s3] sm:$0xff]   ;;  %v841_v60 = vld [vmem:[%s1098_s3 + $0x8] sm:$0xff]   ;;  %v842_v61 = vld [vmem:[%s1098_s3 + $0x10] sm:$0xff]  }
  0x21   :  { %199 = vmatprep.subr.bf16.mxu0 %v801_v8  ;;  %v843_v62 = vld [vmem:[%s1098_s3 + $0x18] sm:$0xff]   ;;  %v844_v63 = vld [vmem:[%s1098_s3 + $0x20] sm:$0xff]   ;;  %v845_v0 = vld [vmem:[%s1098_s3 + $0x28] sm:$0xff]  }
  0x22   :  { %709 = vmatpush3.bf16.msra.mxu1 %v829_v21  ;;  %v846_v1 = vld [vmem:[%s1098_s3 + $0x30] sm:$0xff]   ;;  %v847_v2 = vld [vmem:[%s1098_s3 + $0x38] sm:$0xff]   ;;  %v848_v3 = vld [vmem:[%s1099_s4] sm:$0xff]   ;;  %v428_v21 = vsub.s32 2, %v1007_v43 }
  0x23   :  { %710 = vmatprep.subr.bf16.mxu1 %v830_v22  ;;  %v849_v4 = vld [vmem:[%s1099_s4 + $0x8] sm:$0xff]   ;;  %v850_v5 = vld [vmem:[%s1099_s4 + $0x10] sm:$0xff]   ;;  %v851_v6 = vld [vmem:[%s1099_s4 + $0x18] sm:$0xff]  }
  0x24   :  { %200 = vmatpush1.bf16.msra.mxu0 %v803_v9  ;;  %v852_v7 = vld [vmem:[%s1099_s4 + $0x20] sm:$0xff]   ;;  %v853_v8 = vld [vmem:[%s1099_s4 + $0x28] sm:$0xff]   ;;  %v270_v9 = vsub.s32 1, %v1007_v43  ;;  %v429_v22 = vrot.slane %v1013_v45, %v428_v21 }
  0x25   :  { %201 = vmatprep.subr.bf16.mxu0 %v804_v10 }
  0x26   :  { %711 = vmatpush3.bf16.msra.mxu1 %v831_v26  ;;  %v271_v11 = vrot.slane %v1013_v45, %v270_v9 }
  0x27   :  { %712 = vmatprep.subr.bf16.mxu1 %v832_v27 }
  0x28   :  { %202 = vmatpush1.bf16.msra.mxu0 %v806_v15 }
  0x29   :  { %203 = vmatprep.subr.bf16.mxu0 %v807_v19  ;;  %v854_v19 = vld [vmem:[%s1099_s4 + $0x30] sm:$0xff]  }
  0x2a   :  { %713 = vmatpush3.bf16.msra.mxu1 %v833_v28 }
  0x2b   :  { %714 = vmatprep.subr.bf16.mxu1 %v834_v30  ;;  %v538_v30 = vsub.s32 3, %v1007_v43 }
  0x2c   :  { %204 = vmatpush1.bf16.msra.mxu0 %v809_v20  ;;  %v855_v20 = vld [vmem:[%s1099_s4 + $0x38] sm:$0xff]  }
  0x2d   :  { %205 = vmatprep.subr.bf16.mxu0 %v810_v23 }
  0x2e   :  { %715 = vmatpush3.bf16.msra.mxu1 %v835_v32 }
  0x2f   :  { %716 = vmatprep.subr.bf16.mxu1 %v836_v37 }
  0x30   :  { %206 = vmatpush1.bf16.msra.mxu0 %v812_v24 }
  0x31   :  { %207 = vmatprep.subr.bf16.mxu0 %v813_v25 }
  0x32   :  { %717 = vmatpush3.bf16.msra.mxu1 %v837_v38 }
  0x33   :  { %718 = vmatprep.subr.bf16.mxu1 %v838_v39 }
  0x34   :  { %208 = vmatpush1.bf16.msra.mxu0 %v815_v29 }
  0x35   :  { %209 = vmatprep.subr.bf16.mxu0 %v816_v31  ;;  %v539_v31 = vrot.slane %v1013_v45, %v538_v30 }
  0x36   :  { %719 = vmatpush3.bf16.msra.mxu1 %v839_v40 }
  0x37   :  { %744 = vmatprep.subr.bf16.mxu1 %v887_v41 }
  0x38   :  { %210 = vmatpush1.bf16.msra.mxu0 %v818_v33 }
  0x39   :  { %211 = vmatprep.subr.bf16.mxu0 %v819_v34 }
  0x3c   :  { %212 = vmatpush1.bf16.msra.mxu0 %v821_v35 }
  0x3d   :  { %764 = vmatprep.subr.bf16.mxu0 %v887_v41 }
  0x3f   :  { %224 = vmatmul.mubr.bf16.vlgmr.msra.gmra.mrb[0].mxu0 %v647_v36 }
  0x40   :  { %780 = vmatprep.mubr.msk.bf16.mxu0 %vm888_vm1, %v887_v41  ;;  %765 = vmatpush3.bf16.msra.mxu0 %v848_v3 }
  0x41   :  { %766 = vmatprep.subr.bf16.mxu0 %v887_v41 }
  0x44   :  { %767 = vmatpush3.bf16.msra.mxu0 %v849_v4 }
  0x45   :  { %768 = vmatprep.subr.bf16.mxu0 %v887_v41 }
  0x48   :  { %769 = vmatpush3.bf16.msra.mxu0 %v850_v5 }
  0x49   :  { %770 = vmatprep.subr.bf16.mxu0 %v887_v41 }
  0x4c   :  { %771 = vmatpush3.bf16.msra.mxu0 %v851_v6 }
  0x4d   :  { %772 = vmatprep.subr.bf16.mxu0 %v887_v41 }
  0x50   :  { %773 = vmatpush3.bf16.msra.mxu0 %v852_v7 }
  0x51   :  { %774 = vmatprep.subr.bf16.mxu0 %v887_v41 }
  0x54   :  { %775 = vmatpush3.bf16.msra.mxu0 %v853_v8 }
  0x55   :  { %776 = vmatprep.subr.bf16.mxu0 %v887_v41 }
  0x58   :  { %777 = vmatpush3.bf16.msra.mxu0 %v854_v19 }
  0x59   :  { %778 = vmatprep.subr.bf16.mxu0 %v887_v41 }
  0x5c   :  { %779 = vmatpush3.bf16.msra.mxu0 %v855_v20 }
 0x112   :  { %v225_v49 = vpop.f32.mrb[0].mxu0 }
 0x113   :  { %v226_v50 = vadd.f32 %v225_v49, %v66_v47  ;;  %v227_v51 = vpop.f32.mrb[1].mxu0 }
 0x114   :  { %v228_v52 = vadd.f32 %v227_v51, %v70_v48  ;;  %v229_v53 = vpop.f32.mrb[2].mxu0 }
 0x115   :  { %v232_v54 = vmax.f32 %v226_v50, 0.0  ;;  %v230_v55 = vpop.f32.mrb[3].mxu0 }
 0x116   :  { %v233_v56 = vmax.f32 %v228_v52, 0.0 }
 0x117   :  { %v234_v59 = vpack.c.bf16 %v232_v54, %v232_v54 }
 0x118   :  { %v235_v57 = vpack.c.bf16 %v233_v56, %v233_v56 }
 0x11a   :  { %400 = vmatprep.mubr.bf16.mxu1 %v235_v57 }
 0x11b   :  { %401 = vmatmul.mubr.bf16.vlgmr.msra.gmra.mrb[0].mxu1 %v234_v59 }
 0x11c   :  { %745 = vmatpush3.bf16.msra.mxu1 %v840_v58  ;;  %760 = vmatprep.mubr.msk.bf16.mxu1 %vm888_vm1, %v887_v41 }
 0x11d   :  { %746 = vmatprep.subr.bf16.mxu1 %v887_v41 }
 0x120   :  { %747 = vmatpush3.bf16.msra.mxu1 %v841_v60 }
 0x121   :  { %748 = vmatprep.subr.bf16.mxu1 %v887_v41 }
 0x124   :  { %749 = vmatpush3.bf16.msra.mxu1 %v842_v61 }
 0x125   :  { %750 = vmatprep.subr.bf16.mxu1 %v887_v41 }
 0x128   :  { %751 = vmatpush3.bf16.msra.mxu1 %v843_v62 }
 0x129   :  { %752 = vmatprep.subr.bf16.mxu1 %v887_v41 }
 0x12c   :  { %753 = vmatpush3.bf16.msra.mxu1 %v844_v63 }
 0x12d   :  { %754 = vmatprep.subr.bf16.mxu1 %v887_v41 }
 0x130   :  { %755 = vmatpush3.bf16.msra.mxu1 %v845_v0 }
 0x131   :  { %756 = vmatprep.subr.bf16.mxu1 %v887_v41 }
 0x134   :  { %757 = vmatpush3.bf16.msra.mxu1 %v846_v1 }
 0x135   :  { %758 = vmatprep.subr.bf16.mxu1 %v887_v41 }
 0x138   :  { %759 = vmatpush3.bf16.msra.mxu1 %v847_v2 }
 0x1ee   :  { %v720_v10 = vpop.f32.mrb[0].mxu1 }
 0x1ef   :  { %v721_v12 = vpop.f32.mrb[1].mxu1 }
 0x1f0   :  { %v722_v13 = vadd.f32 %v721_v12, %v720_v10  ;;  %v723_v14 = vpop.f32.mrb[2].mxu1 }
 0x1f1   :  { %v724_v15 = vpop.f32.mrb[3].mxu1 }
 0x1f2   :  { %v403_v16 = vadd.f32 %v722_v13, %v271_v11 }
 0x1f4   :  { %v408_v17 = vmax.f32 %v403_v16, 0.0 }
 0x1f6   :  { %v409_v18 = vpack.c.bf16 %v408_v17, %v408_v17 }
 0x1f8   :  { %761 = vmatmul.mubr.bf16.vlgmr.msra.gmra.mrb[4].mxu1 %v409_v18 }
 0x2cb   :  { %v512_v23 = vpop.f32.mrb[4].mxu1 }
 0x2cc   :  { %v513_v24 = vadd.f32 %v512_v23, %v429_v22  ;;  %v762_v25 = vpop.f32.mrb[5].mxu1 }
 0x2cd   :  { %v515_v26 = vpop.f32.mrb[6].mxu1 }
 0x2ce   :  { %v518_v27 = vmax.f32 %v513_v24, 0.0  ;;  %v763_v28 = vpop.f32.mrb[7].mxu1 }
 0x2d0   :  { %v519_v29 = vpack.c.bf16 %v518_v27, %v518_v27 }
 0x2d2   :  { %781 = vmatmul.mubr.bf16.vlgmr.msra.gmra.mrb[4].mxu0 %v519_v29 }
 0x3a5   :  { %v622_v32 = vpop.f32.mrb[4].mxu0 }
 0x3a6   :  { %v623_v33 = vadd.f32 %v622_v32, %v539_v31  ;;  %v782_v34 = vpop.f32.mrb[5].mxu0 }
 0x3a7   :  { %v625_v35 = vpop.f32.mrb[6].mxu0 }
 0x3a8   :  { %v783_v36 = vpop.f32.mrb[7].mxu0  ;;  %v629_v37 = vsel %vm628_vm2, %v623_v33, -inf }
 0x3a9   :  { %630 = vmax.xlane.f32.xlu0 %v629_v37 }
 0x436   :  { %v631_v38 = vpop.xlane.xlu0 %630 }
 0x437   :  { %v632_v39 = vsub.f32 %v623_v33, %v631_v38 }
 0x439   :  { %v633_v40 = vmul.f32 1.442695, %v632_v39 }
 0x43b   :  { %856 = vpow2.f32 %v633_v40 }
 0x445   :  { %v857_v41 = vpop.eup %856 }
 0x446   :  { %v635_v42 = vsel %vm628_vm2, %v857_v41, 0.0 }
 0x447   :  { %636 = vadd.xlane.f32.xlu0 %v635_v42 }
 0x4d4   :  { %v637_v43 = vpop.xlane.xlu0 %636 }
 0x4d5   :  { %858 = vlog2.f32 %v637_v43 }
 0x4df   :  { %v859_v44 = vpop.eup %858 }
 0x4e0   :  { %v639_v45 = vmul.f32 0.6931472, %v859_v44 }
 0x4e2   :  { %v640_v46 = vsub.f32 %v632_v39, %v639_v45 }
 0x4e4   :  { %641 = vst.msk [vmem:[%s1101_s6] sm:$0xff] %vm628_vm2, %v640_v46 }
 0x4e5   :  { %646 = vsyncpa [#allocation3], 1 }

</bundles_post_ra>
